<compile_context>
chip_gen: v6e
topology: v6e:2x2x1
jax: 0.10.0
libtpu: 0.0.40
codegen_flags: <defaults>
</compile_context>

<pallas_src>
import jax
import jax.numpy as jnp
from jax.experimental import pallas as pl
from jax.experimental.pallas import tpu as pltpu


def local_aggr_kernel(h_ref, w_ref, bk_ref, o_ref):
    """One (graph-batch tile i, feature-column tile j) block.

    h_ref : (tile_b, N, D)     node features of tile_b graphs (resident across j)
    w_ref : (D, 2*tile_d)      fused weights, columns = [Wq_tile_j | Wk_tile_j]
    bk_ref: (1, tile_d)        Wk bias for this column tile (bq is softmax-dead)
    o_ref : (tile_b, N, tile_d)
    """
    tb, N, D = h_ref.shape
    td = o_ref.shape[-1]

    # Flatten the graph-batch axis into the matmul rows: one MXU matmul per
    # step over all tb*N nodes (layout-free reshape: last dim stays 128-lane,
    # N % 8 == 0 keeps sublane grouping identical).
    h2 = h_ref[...].reshape(tb * N, D)
    fused = jnp.dot(h2, w_ref[...], preferred_element_type=jnp.float32)  # (tb*N, 2*td)

    gate = fused[:, :td].reshape(tb, N, td)
    feat = fused[:, td:].reshape(tb, N, td) + bk_ref[...]                # bias bcast

    # dgl.softmax_nodes: softmax over the node axis, per graph, per column.
    # bq was dropped: a per-column constant cancels exactly under this softmax.
    m = jnp.max(gate, axis=1, keepdims=True)                             # (tb,1,td)
    e = jnp.exp(gate - m)
    s = jnp.sum(e, axis=1, keepdims=True)
    inv = pl.reciprocal(s, approx=True)                                  # EUP slot

    o_ref[...] = (feat * e * inv).astype(o_ref.dtype)


def prepare_params(wq, bq, wk, bk, *, tile_d=None, mxu_dtype=jnp.float32):
    """One-time parameter prep (hoisted out of the per-call path).

    wq/wk: PyTorch-style (out, in); bq/bk: (out,).
    Returns (w_fused, bk2, tile_d) where w_fused has shape (D, n_tiles*2*tile_d)
    with the column tiles of Wq^T and Wk^T interleaved so each grid step reads
    one contiguous (D, 2*tile_d) slab.
    """
    del bq  # exactly cancels under softmax over the node axis
    D = wq.shape[0]
    if tile_d is None:
        # Lane-aligned column tiles; modest slab sizes keep double-buffered
        # weight tiles well under v7x's 64 MiB VMEM.
        for cand in (512, 256, 128):
            if D % cand == 0:
                tile_d = cand
                break
        else:
            tile_d = D  # full-extent block (any D allowed when untiled)
    n_tiles = D // tile_d

    wq_t = jnp.asarray(wq, jnp.float32).T.reshape(D, n_tiles, tile_d)   # (in, out)
    wk_t = jnp.asarray(wk, jnp.float32).T.reshape(D, n_tiles, tile_d)
    w_fused = jnp.concatenate([wq_t, wk_t], axis=-1)                    # (D, nt, 2*td)
    w_fused = w_fused.reshape(D, n_tiles * 2 * tile_d).astype(mxu_dtype)
    bk2 = jnp.asarray(bk, jnp.float32).reshape(1, D)
    return w_fused, bk2, tile_d


def _choose_tile_b(B, N, D, itemsize, budget_bytes=2 << 20):
    """Largest divisor of B whose h tile fits a modest VMEM budget."""
    tile_b = 1
    for cand in range(B, 0, -1):
        if B % cand == 0 and cand * N * D * itemsize <= budget_bytes:
            tile_b = cand
            break
    return tile_b


def local_aggr(h, w_fused, bk2, tile_d, tile_b=None):
    """h: (B, N, D) — B equal-size graphs with N nodes each (B=1 for a single graph)."""
    B, N, D = h.shape
    n_tiles = D // tile_d
    h = h.astype(w_fused.dtype)  # match MXU operand dtype (f32 here; bf16 optional)
    if tile_b is None:
        tile_b = _choose_tile_b(B, N, D, h.dtype.itemsize)

    return pl.pallas_call(
        local_aggr_kernel,
        out_shape=jax.ShapeDtypeStruct((B, N, D), jnp.float32),
        grid_spec=pltpu.PrefetchScalarGridSpec(
            num_scalar_prefetch=0,
            grid=(B // tile_b, n_tiles),
            in_specs=[
                # h tile: constant block across j (inner axis) -> stays resident.
                pl.BlockSpec((tile_b, N, D), lambda i, j: (i, 0, 0)),
                pl.BlockSpec((D, 2 * tile_d), lambda i, j: (0, j)),   # fused W tile
                pl.BlockSpec((1, tile_d), lambda i, j: (0, j)),       # bk tile
            ],
            out_specs=pl.BlockSpec((tile_b, N, tile_d), lambda i, j: (i, 0, j)),
        ),
        compiler_params=pltpu.CompilerParams(
            dimension_semantics=("parallel", "parallel")),
    )(h, w_fused, bk2)


def local_aggr_ref(h, wq, bq, wk, bk):
    """Pure-JAX reference mirroring the PyTorch forward (per-graph node softmax)."""
    h = h.astype(jnp.float32)
    gate = jnp.einsum("bnd,od->bno", h, wq.astype(jnp.float32)) + bq
    feat = jnp.einsum("bnd,od->bno", h, wk.astype(jnp.float32)) + bk
    gate = jax.nn.softmax(gate, axis=1)  # softmax over nodes within each graph
    return feat * gate


if __name__ == "__main__":
    key = jax.random.PRNGKey(0)
    # 8 equal-size graphs of 16 nodes each; hid_dim=128 keeps vregs lane-dense.
    B, N, hid_dim = 8, 16, 128

    k_h, k_wq, k_bq, k_wk, k_bk = jax.random.split(key, 5)

    # g.ndata['h'] per graph -> (N, hid_dim); unsqueeze(-1).view(-1, hid_dim) is identity.
    h = jax.random.normal(k_h, (B, N, hid_dim), dtype=jnp.float32)

    # Deterministic Linear init (PyTorch-style uniform(-1/sqrt(in), 1/sqrt(in))).
    bound = 1.0 / jnp.sqrt(jnp.float32(hid_dim))
    wq = jax.random.uniform(k_wq, (hid_dim, hid_dim), jnp.float32, -bound, bound)
    bq = jax.random.uniform(k_bq, (hid_dim,), jnp.float32, -bound, bound)
    wk = jax.random.uniform(k_wk, (hid_dim, hid_dim), jnp.float32, -bound, bound)
    bk = jax.random.uniform(k_bk, (hid_dim,), jnp.float32, -bound, bound)

    # One-time parameter prep (transpose + fuse + cast), then the kernel call.
    w_fused, bk2, tile_d = prepare_params(wq, bq, wk, bk)
    out = local_aggr(h, w_fused, bk2, tile_d)
    out = jax.block_until_ready(out)

    ref = local_aggr_ref(h, wq, bq, wk, bk)
    assert out.shape == (B, N, hid_dim)
    assert jnp.allclose(out, ref, atol=1e-3, rtol=1e-3), "mismatch vs reference"

    print("KERNEL_OK")
</pallas_src>

<mosaic_0001>
module attributes {stable_mosaic.version = 11 : i64} {
  func.func @local_aggr_kernel(%arg0: i32, %arg1: i32, %arg2: memref<8x16x128xf32, #tpu.memory_space<vmem>>, %arg3: memref<128x256xf32, #tpu.memory_space<vmem>>, %arg4: memref<1x128xf32, #tpu.memory_space<vmem>>, %arg5: memref<8x16x128xf32, #tpu.memory_space<vmem>>) attributes {dimension_semantics = [#tpu.dimension_semantics<parallel>, #tpu.dimension_semantics<parallel>], iteration_bounds = array<i64: 1, 1>, scalar_prefetch = 0 : i64, scratch_operands = 0 : i64, tpu.core_type = #tpu.core_type<tc>, window_params = [{transform_indices = @transform_0, window_bounds = array<i64: 8, 16, 128>}, {transform_indices = @transform_1, window_bounds = array<i64: 128, 256>}, {transform_indices = @transform_2, window_bounds = array<i64: 1, 128>}, {transform_indices = @transform_3, window_bounds = array<i64: 8, 16, 128>}]} {
    %c0 = arith.constant 0 : index
    %c0_0 = arith.constant 0 : index
    %c0_1 = arith.constant 0 : index
    %0 = vector.load %arg2[%c0, %c0_0, %c0_1] : memref<8x16x128xf32, #tpu.memory_space<vmem>>, vector<8x16x128xf32>
    %1 = vector.shape_cast %0 : vector<8x16x128xf32> to vector<128x128xf32>
    %c0_2 = arith.constant 0 : index
    %c0_3 = arith.constant 0 : index
    %2 = vector.load %arg3[%c0_2, %c0_3] : memref<128x256xf32, #tpu.memory_space<vmem>>, vector<128x256xf32>
    %cst = arith.constant dense<0.000000e+00> : vector<128x256xf32>
    %3 = tpu.matmul %1, %2, %cst {dimension_numbers = #tpu.dot_dimension_numbers<[1], [0], [0], [1], [0, 0, 1, 1], [], []>} : vector<128x128xf32>, vector<128x256xf32>, vector<128x256xf32> -> vector<128x256xf32>
    %4 = vector.extract_strided_slice %3 {offsets = [0, 0], sizes = [128, 128], strides = [1, 1]} : vector<128x256xf32> to vector<128x128xf32>
    %5 = vector.shape_cast %4 : vector<128x128xf32> to vector<8x16x128xf32>
    %6 = vector.extract_strided_slice %3 {offsets = [0, 128], sizes = [128, 128], strides = [1, 1]} : vector<128x256xf32> to vector<128x128xf32>
    %7 = vector.shape_cast %6 : vector<128x128xf32> to vector<8x16x128xf32>
    %c0_4 = arith.constant 0 : index
    %c0_5 = arith.constant 0 : index
    %8 = vector.load %arg4[%c0_4, %c0_5] : memref<1x128xf32, #tpu.memory_space<vmem>>, vector<1x128xf32>
    %9 = vector.shape_cast %8 : vector<1x128xf32> to vector<1x1x128xf32>
    %10 = vector.broadcast %9 : vector<1x1x128xf32> to vector<8x16x128xf32>
    %11 = arith.addf %7, %10 : vector<8x16x128xf32>
    %cst_6 = arith.constant dense<0xFF800000> : vector<8x128xf32>
    %12 = vector.multi_reduction <maximumf>, %5, %cst_6 [1] : vector<8x16x128xf32> to vector<8x128xf32>
    %13 = vector.shape_cast %12 : vector<8x128xf32> to vector<8x1x128xf32>
    %14 = vector.broadcast %13 : vector<8x1x128xf32> to vector<8x16x128xf32>
    %15 = arith.subf %5, %14 : vector<8x16x128xf32>
    %16 = math.exp %15 : vector<8x16x128xf32>
    %cst_7 = arith.constant dense<0.000000e+00> : vector<8x128xf32>
    %17 = vector.multi_reduction <add>, %16, %cst_7 [1] : vector<8x16x128xf32> to vector<8x128xf32>
    %18 = vector.shape_cast %17 : vector<8x128xf32> to vector<8x1x128xf32>
    %19 = tpu.reciprocal %18 {approx = true} : vector<8x1x128xf32> -> vector<8x1x128xf32>
    %20 = arith.mulf %11, %16 : vector<8x16x128xf32>
    %21 = vector.broadcast %19 : vector<8x1x128xf32> to vector<8x16x128xf32>
    %22 = arith.mulf %20, %21 : vector<8x16x128xf32>
    %c0_8 = arith.constant 0 : index
    %c0_9 = arith.constant 0 : index
    %c0_10 = arith.constant 0 : index
    %23 = vector.load %arg5[%c0_8, %c0_9, %c0_10] : memref<8x16x128xf32, #tpu.memory_space<vmem>>, vector<8x16x128xf32>
    tpu.vector_store %arg5[%c0_8, %c0_9, %c0_10], %22 {strides = array<i32>} : memref<8x16x128xf32, #tpu.memory_space<vmem>>, vector<8x16x128xf32>,
    return
  }
  func.func @transform_0(%arg0: i32, %arg1: i32) -> (i32, i32, i32) {
    %c0_i32 = arith.constant 0 : i32
    %c0_i32_0 = arith.constant 0 : i32
    %c0_i32_1 = arith.constant 0 : i32
    return %arg0, %c0_i32, %c0_i32_0 : i32, i32, i32
  }
  func.func @transform_1(%arg0: i32, %arg1: i32) -> (i32, i32) {
    %c0_i32 = arith.constant 0 : i32
    %c0_i32_0 = arith.constant 0 : i32
    return %c0_i32, %arg1 : i32, i32
  }
  func.func @transform_2(%arg0: i32, %arg1: i32) -> (i32, i32) {
    %c0_i32 = arith.constant 0 : i32
    %c0_i32_0 = arith.constant 0 : i32
    return %c0_i32, %arg1 : i32, i32
  }
  func.func @transform_3(%arg0: i32, %arg1: i32) -> (i32, i32, i32) {
    %c0_i32 = arith.constant 0 : i32
    %c0_i32_0 = arith.constant 0 : i32
    return %arg0, %c0_i32, %arg1 : i32, i32, i32
  }
}

</mosaic_0001>

<bundles_post_ra>
// kernel: tpu_custom_call.1
= control target key start
LH: loop header
LB: loop body
LE: loop exit
PB: predicated region body
PF: predicated region fallthrough
CT: control target
= control target key end

     0   :  { %8 = vsyncpa [#allocation3], 0  ;;  %s898_s0 = inlined_call_operand.hbm [shape: f32[8,16,128], index: 0, kind: input, shape index: {}]   ;;  %s899_s1 = inlined_call_operand.hbm [shape: f32[128,256], index: 1, kind: input, shape index: {}]   ;;  %s900_s2 = inlined_call_operand.vmem [shape: f32[1,128], index: 2, kind: input, shape index: {}]   ;;  %s901_s3 = inlined_call_operand.hbm [shape: f32[8,16,128], index: 3, kind: output, shape index: {}]  }
   0x1   :  { %9 = vsyncpa [#allocation6], 0 }
   0x2   :  { %10 = vsyncpa [#allocation4], 0  ;;  %s664_s12 = smov [#allocation2]  }
   0x3   :  { %s16_s13 = sshll.u32 %s664_s12, 4  ;;  %s17_s13 = int_to_ptr.vmem [resolvable:$true] %s16_s13 }
   0x4   :  { %s606_s14 = scalar_lea.vmem %s17_s13, 2048  ;;  %p611_p1 = scmp.lt.s32.totalorder %s17_s13, %s17_s13 }
   0x5   :  { %p607_p0 = scmp.ne.s32.totalorder %s17_s13, %s606_s14  ;;  %p612_p2 = scmp.lt.s32.totalorder %s606_s14, %s606_s14 }
   0x7   :  { %p613_p3 = por %p612_p2, %p611_p1 }
   0x9   :  { %p614_p4 = pnand %p613_p3, %p607_p0 }
   0xb   :  { %617 = shalt.err (!%p614_p4)
}
   0xc   :  { %s665_s15 = smov 128   ;;  %s666_s16 = smov 8  }
   0xd   :  { %22 = dma.hbm_to_vmem [thread:$0]  %s898_s0, 2048, %s17_s13, [#allocation3], %s665_s15, %s665_s15, %s666_s16  }
   0xe   :  { %s667_s19 = smov [#allocation5]  }
   0xf   :  { %s28_s20 = sshll.u32 %s667_s19, 4  ;;  %s29_s20 = int_to_ptr.vmem [resolvable:$true] %s28_s20 }
  0x10   :  { %s626_s21 = scalar_lea.vmem %s29_s20, 4096  ;;  %p631_p6 = scmp.lt.s32.totalorder %s29_s20, %s29_s20 }
  0x11   :  { %p627_p5 = scmp.ne.s32.totalorder %s29_s20, %s626_s21  ;;  %p632_p7 = scmp.lt.s32.totalorder %s626_s21, %s626_s21 }
  0x13   :  { %p633_p8 = por %p632_p7, %p631_p6 }
  0x15   :  { %p634_p9 = pnand %p633_p8, %p627_p5 }
  0x17   :  { %637 = shalt.err (!%p634_p9)
}
  0x18   :  { %s668_s22 = smov 256   ;;  %s669_s23 = smov 16  }
  0x19   :  { %34 = dma.hbm_to_vmem [thread:$0]  %s899_s1, 4096, %s29_s20, [#allocation6], %s668_s22, %s668_s22, %s669_s23  }
  0x1a   :  { %658 = dma.done.wait [#allocation3], 2048  }
  0x1b   :  { %659 = vsyncadd [#allocation3], 4294965248 }
  0x1c   :  { %660 = dma.done.wait [#allocation6], 4096  }
  0x1d   :  { %661 = vsyncadd [#allocation6], 4294963200  ;;  %v670_v0 = vmov 0.0   ;;  %v90_v1 = vld [vmem:[#allocation5 + $0xf8] sm:$0xff]  ;;  %v89_v2 = vld [vmem:[#allocation5 + $0xf0] sm:$0xff] }
  0x1e   :  { %155 = vmatprep.mubr.f32.mxu0 %v670_v0  ;;  %203 = vmatprep.mubr.f32.mxu1 %v670_v0  ;;  %v88_v3 = vld [vmem:[#allocation5 + $0xe8] sm:$0xff]  ;;  %v87_v4 = vld [vmem:[#allocation5 + $0xe0] sm:$0xff]  ;;  %v86_v5 = vld [vmem:[#allocation5 + $0xd8] sm:$0xff] }
  0x1f   :  { %91 = vmatprep.subr.mxu0 %v90_v1  ;;  %510 = vmatprep.subr.mxu1 %v90_v1  ;;  %v85_v6 = vld [vmem:[#allocation5 + $0xd0] sm:$0xff]  ;;  %v84_v7 = vld [vmem:[#allocation5 + $0xc8] sm:$0xff]  ;;  %v83_v8 = vld [vmem:[#allocation5 + $0xc0] sm:$0xff] }
  0x20   :  { %92 = vmatpush1.msra.mxu0 %v89_v2  ;;  %526 = vmatpush1.msra.mxu1 %v89_v2  ;;  %v82_v9 = vld [vmem:[#allocation5 + $0xb8] sm:$0xff]  ;;  %v81_v10 = vld [vmem:[#allocation5 + $0xb0] sm:$0xff]  ;;  %v80_v11 = vld [vmem:[#allocation5 + $0xa8] sm:$0xff] }
  0x21   :  { %93 = vmatprep.subr.mxu0 %v88_v3  ;;  %511 = vmatprep.subr.mxu1 %v88_v3  ;;  %v79_v12 = vld [vmem:[#allocation5 + $0xa0] sm:$0xff]  ;;  %v78_v13 = vld [vmem:[#allocation5 + $0x98] sm:$0xff]  ;;  %v77_v14 = vld [vmem:[#allocation5 + $0x90] sm:$0xff] }
  0x22   :  { %94 = vmatpush1.msra.mxu0 %v87_v4  ;;  %527 = vmatpush1.msra.mxu1 %v87_v4  ;;  %v76_v15 = vld [vmem:[#allocation5 + $0x88] sm:$0xff]  ;;  %v75_v16 = vld [vmem:[#allocation5 + $0x80] sm:$0xff]  ;;  %v74_v17 = vld [vmem:[#allocation5 + $0x78] sm:$0xff] }
  0x23   :  { %95 = vmatprep.subr.mxu0 %v86_v5  ;;  %512 = vmatprep.subr.mxu1 %v86_v5  ;;  %v73_v18 = vld [vmem:[#allocation5 + $0x70] sm:$0xff]  ;;  %v72_v19 = vld [vmem:[#allocation5 + $0x68] sm:$0xff]  ;;  %v71_v20 = vld [vmem:[#allocation5 + $0x60] sm:$0xff] }
  0x24   :  { %96 = vmatpush1.msra.mxu0 %v85_v6  ;;  %528 = vmatpush1.msra.mxu1 %v85_v6  ;;  %v70_v21 = vld [vmem:[#allocation5 + $0x58] sm:$0xff]  ;;  %v69_v22 = vld [vmem:[#allocation5 + $0x50] sm:$0xff]  ;;  %v68_v23 = vld [vmem:[#allocation5 + $0x48] sm:$0xff] }
  0x25   :  { %97 = vmatprep.subr.mxu0 %v84_v7  ;;  %513 = vmatprep.subr.mxu1 %v84_v7  ;;  %v67_v24 = vld [vmem:[#allocation5 + $0x40] sm:$0xff]  ;;  %v66_v25 = vld [vmem:[#allocation5 + $0x38] sm:$0xff]  ;;  %v65_v26 = vld [vmem:[#allocation5 + $0x30] sm:$0xff] }
  0x26   :  { %98 = vmatpush1.msra.mxu0 %v83_v8  ;;  %529 = vmatpush1.msra.mxu1 %v83_v8  ;;  %v64_v27 = vld [vmem:[#allocation5 + $0x28] sm:$0xff]  ;;  %v63_v28 = vld [vmem:[#allocation5 + $0x20] sm:$0xff]  ;;  %v62_v29 = vld [vmem:[#allocation5 + $0x18] sm:$0xff] }
  0x27   :  { %99 = vmatprep.subr.mxu0 %v82_v9  ;;  %514 = vmatprep.subr.mxu1 %v82_v9  ;;  %v61_v30 = vld [vmem:[#allocation5 + $0x10] sm:$0xff]  ;;  %v60_v31 = vld [vmem:[#allocation5 + $0x8] sm:$0xff]  ;;  %v59_v32 = vld [vmem:[#allocation5] sm:$0xff] }
  0x28   :  { %100 = vmatpush1.msra.mxu0 %v81_v10  ;;  %530 = vmatpush1.msra.mxu1 %v81_v10  ;;  %v43_v33 = vld [vmem:[#allocation2] sm:$0xff]  ;;  %v44_v35 = vld [vmem:[#allocation2 + $0x8] sm:$0xff]  ;;  %v45_v37 = vld [vmem:[#allocation2 + $0x10] sm:$0xff] }
  0x29   :  { %101 = vmatprep.subr.mxu0 %v80_v11  ;;  %515 = vmatprep.subr.mxu1 %v80_v11  ;;  %v51_v34 = vld [vmem:[#allocation2 + $0x40] sm:$0xff]  ;;  %v52_v36 = vld [vmem:[#allocation2 + $0x48] sm:$0xff]  ;;  %v53_v38 = vld [vmem:[#allocation2 + $0x50] sm:$0xff] }
  0x2a   :  { %102 = vmatpush1.msra.mxu0 %v79_v12  ;;  %531 = vmatpush1.msra.mxu1 %v79_v12  ;;  %v46_v39 = vld [vmem:[#allocation2 + $0x18] sm:$0xff]  ;;  %v47_v41 = vld [vmem:[#allocation2 + $0x20] sm:$0xff]  ;;  %v48_v43 = vld [vmem:[#allocation2 + $0x28] sm:$0xff] }
  0x2b   :  { %103 = vmatprep.subr.mxu0 %v78_v13  ;;  %516 = vmatprep.subr.mxu1 %v78_v13  ;;  %v54_v40 = vld [vmem:[#allocation2 + $0x58] sm:$0xff]  ;;  %v55_v42 = vld [vmem:[#allocation2 + $0x60] sm:$0xff]  ;;  %v56_v44 = vld [vmem:[#allocation2 + $0x68] sm:$0xff] }
  0x2c   :  { %104 = vmatpush1.msra.mxu0 %v77_v14  ;;  %532 = vmatpush1.msra.mxu1 %v77_v14  ;;  %v49_v45 = vld [vmem:[#allocation2 + $0x30] sm:$0xff]  ;;  %v50_v47 = vld [vmem:[#allocation2 + $0x38] sm:$0xff] }
  0x2d   :  { %105 = vmatprep.subr.mxu0 %v76_v15  ;;  %517 = vmatprep.subr.mxu1 %v76_v15  ;;  %v57_v46 = vld [vmem:[#allocation2 + $0x70] sm:$0xff]  ;;  %v58_v48 = vld [vmem:[#allocation2 + $0x78] sm:$0xff] }
  0x2e   :  { %106 = vmatpush1.msra.mxu0 %v75_v16  ;;  %533 = vmatpush1.msra.mxu1 %v75_v16 }
  0x2f   :  { %107 = vmatprep.subr.mxu0 %v74_v17  ;;  %518 = vmatprep.subr.mxu1 %v74_v17 }
  0x30   :  { %108 = vmatpush1.msra.mxu0 %v73_v18  ;;  %534 = vmatpush1.msra.mxu1 %v73_v18 }
  0x31   :  { %109 = vmatprep.subr.mxu0 %v72_v19  ;;  %519 = vmatprep.subr.mxu1 %v72_v19 }
  0x32   :  { %110 = vmatpush1.msra.mxu0 %v71_v20  ;;  %535 = vmatpush1.msra.mxu1 %v71_v20 }
  0x33   :  { %111 = vmatprep.subr.mxu0 %v70_v21  ;;  %520 = vmatprep.subr.mxu1 %v70_v21 }
  0x34   :  { %112 = vmatpush1.msra.mxu0 %v69_v22  ;;  %536 = vmatpush1.msra.mxu1 %v69_v22 }
  0x35   :  { %113 = vmatprep.subr.mxu0 %v68_v23  ;;  %521 = vmatprep.subr.mxu1 %v68_v23 }
  0x36   :  { %114 = vmatpush1.msra.mxu0 %v67_v24  ;;  %537 = vmatpush1.msra.mxu1 %v67_v24 }
  0x37   :  { %115 = vmatprep.subr.mxu0 %v66_v25  ;;  %522 = vmatprep.subr.mxu1 %v66_v25 }
  0x38   :  { %116 = vmatpush1.msra.mxu0 %v65_v26  ;;  %538 = vmatpush1.msra.mxu1 %v65_v26 }
  0x39   :  { %117 = vmatprep.subr.mxu0 %v64_v27  ;;  %523 = vmatprep.subr.mxu1 %v64_v27 }
  0x3a   :  { %118 = vmatpush1.msra.mxu0 %v63_v28  ;;  %539 = vmatpush1.msra.mxu1 %v63_v28 }
  0x3b   :  { %119 = vmatprep.subr.mxu0 %v62_v29  ;;  %524 = vmatprep.subr.mxu1 %v62_v29 }
  0x3c   :  { %120 = vmatpush1.msra.mxu0 %v61_v30  ;;  %540 = vmatpush1.msra.mxu1 %v61_v30 }
  0x3d   :  { %121 = vmatprep.subr.mxu0 %v60_v31  ;;  %525 = vmatprep.subr.mxu1 %v60_v31 }
  0x3e   :  { %122 = vmatpush1.msra.mxu0 %v59_v32  ;;  %541 = vmatpush1.msra.mxu1 %v59_v32 }
  0x3f   :  { %156 = vmatmul.mubr.f32.vlgmr.msra.gmra.mxu0 %v43_v33  ;;  %204 = vmatmul.mubr.f32.vlgmr.msra.gmra.mxu1 %v51_v34 }
  0x40   :  { %161 = vmatprep.mubr.f32.mxu0 %v670_v0  ;;  %209 = vmatprep.mubr.f32.mxu1 %v670_v0 }
  0x43   :  { %162 = vmatmul.mubr.f32.gmra.mxu0 %v44_v35  ;;  %210 = vmatmul.mubr.f32.gmra.mxu1 %v52_v36 }
  0x44   :  { %167 = vmatprep.mubr.f32.mxu0 %v670_v0  ;;  %215 = vmatprep.mubr.f32.mxu1 %v670_v0 }
  0x47   :  { %168 = vmatmul.mubr.f32.gmra.mxu0 %v45_v37  ;;  %216 = vmatmul.mubr.f32.gmra.mxu1 %v53_v38 }
  0x48   :  { %173 = vmatprep.mubr.f32.mxu0 %v670_v0  ;;  %221 = vmatprep.mubr.f32.mxu1 %v670_v0 }
  0x4b   :  { %174 = vmatmul.mubr.f32.gmra.mxu0 %v46_v39  ;;  %222 = vmatmul.mubr.f32.gmra.mxu1 %v54_v40 }
  0x4c   :  { %179 = vmatprep.mubr.f32.mxu0 %v670_v0  ;;  %227 = vmatprep.mubr.f32.mxu1 %v670_v0 }
  0x4f   :  { %180 = vmatmul.mubr.f32.gmra.mxu0 %v47_v41  ;;  %228 = vmatmul.mubr.f32.gmra.mxu1 %v55_v42 }
  0x50   :  { %185 = vmatprep.mubr.f32.mxu0 %v670_v0  ;;  %233 = vmatprep.mubr.f32.mxu1 %v670_v0 }
  0x53   :  { %186 = vmatmul.mubr.f32.gmra.mxu0 %v48_v43  ;;  %234 = vmatmul.mubr.f32.gmra.mxu1 %v56_v44 }
  0x54   :  { %191 = vmatprep.mubr.f32.mxu0 %v670_v0  ;;  %239 = vmatprep.mubr.f32.mxu1 %v670_v0 }
  0x57   :  { %192 = vmatmul.mubr.f32.gmra.mxu0 %v49_v45  ;;  %240 = vmatmul.mubr.f32.gmra.mxu1 %v57_v46 }
  0x58   :  { %197 = vmatprep.mubr.f32.mxu0 %v670_v0  ;;  %245 = vmatprep.mubr.f32.mxu1 %v670_v0 }
  0x5b   :  { %198 = vmatmul.mubr.f32.gmra.mxu0 %v50_v47  ;;  %246 = vmatmul.mubr.f32.gmra.mxu1 %v58_v48 }
  0xff   :  { %v157_v49 = vpop.f32.mrf.mxu0  ;;  %v205_v50 = vpop.f32.mrf.mxu1 }
 0x101   :  { %v717_v51 = vpop.f32.mrf.mxu0  ;;  %v719_v52 = vpop.f32.mrf.mxu1 }
 0x103   :  { %v163_v53 = vpop.f32.mrf.mxu0  ;;  %v211_v54 = vpop.f32.mrf.mxu1 }
 0x104   :  { %v275_v55 = vmax.f32 %v157_v49, %v163_v53  ;;  %v303_v56 = vmax.f32 %v205_v50, %v211_v54 }
 0x105   :  { %v721_v57 = vpop.f32.mrf.mxu0  ;;  %v723_v58 = vpop.f32.mrf.mxu1 }
 0x106   :  { %v276_v59 = vrot.slane %v275_v55, 4  ;;  %v304_v60 = vrot.slane %v303_v56, 4 }
 0x107   :  { %v725_v61 = vpop.f32.mrf.mxu0  ;;  %v727_v62 = vpop.f32.mrf.mxu1 }
 0x108   :  { %v277_v63 = vmax.f32 %v275_v55, %v276_v59  ;;  %v305_v0 = vmax.f32 %v303_v56, %v304_v60 }
 0x109   :  { %v729_v1 = vpop.f32.mrf.mxu0  ;;  %v731_v2 = vpop.f32.mrf.mxu1 }
 0x10a   :  { %v278_v3 = vrot.slane %v277_v63, 2  ;;  %v306_v4 = vrot.slane %v305_v0, 2 }
 0x10b   :  { %v733_v5 = vpop.f32.mrf.mxu0  ;;  %v735_v6 = vpop.f32.mrf.mxu1 }
 0x10c   :  { %v279_v7 = vmax.f32 %v277_v63, %v278_v3  ;;  %v307_v8 = vmax.f32 %v305_v0, %v306_v4  ;;  %v282_v9 = vmax.f32 %v725_v61, %v733_v5  ;;  %v310_v10 = vmax.f32 %v727_v62, %v735_v6 }
 0x10d   :  { %v741_v11 = vpop.f32.mrf.mxu0  ;;  %v743_v12 = vpop.f32.mrf.mxu1 }
 0x10e   :  { %v280_v13 = vrot.slane %v279_v7, 1  ;;  %v308_v14 = vrot.slane %v307_v8, 1  ;;  %v283_v15 = vrot.slane %v282_v9, 4  ;;  %v311_v16 = vrot.slane %v310_v10, 4 }
 0x10f   :  { %v745_v17 = vpop.f32.mrf.mxu0  ;;  %v747_v18 = vpop.f32.mrf.mxu1 }
 0x110   :  { %v281_v19 = vmax.f32 %v279_v7, %v280_v13  ;;  %v309_v20 = vmax.f32 %v307_v8, %v308_v14  ;;  %v284_v21 = vmax.f32 %v282_v9, %v283_v15  ;;  %v312_v22 = vmax.f32 %v310_v10, %v311_v16 }
 0x111   :  { %v749_v23 = vpop.f32.mrf.mxu0  ;;  %v751_v24 = vpop.f32.mrf.mxu1 }
 0x112   :  { %v331_v25 = vsub.f32 %v157_v49, %v281_v19  ;;  %v332_v26 = vsub.f32 %v163_v53, %v281_v19  ;;  %v339_v27 = vsub.f32 %v205_v50, %v309_v20  ;;  %v340_v28 = vsub.f32 %v211_v54, %v309_v20 }
 0x113   :  { %v285_v29 = vrot.slane %v284_v21, 2  ;;  %v313_v30 = vrot.slane %v312_v22, 2  ;;  %v753_v31 = vpop.f32.mrf.mxu0  ;;  %v755_v32 = vpop.f32.mrf.mxu1 }
 0x114   :  { %v347_v33 = vmul.f32 1.442695, %v331_v25  ;;  %v349_v34 = vmul.f32 1.442695, %v332_v26  ;;  %v363_v35 = vmul.f32 1.442695, %v339_v27  ;;  %v289_v36 = vmax.f32 %v745_v17, %v753_v31 }
 0x115   :  { %v365_v37 = vmul.f32 1.442695, %v340_v28  ;;  %v286_v38 = vmax.f32 %v284_v21, %v285_v29  ;;  %v314_v39 = vmax.f32 %v312_v22, %v313_v30  ;;  %v317_v40 = vmax.f32 %v747_v18, %v755_v32  ;;  %v761_v41 = vpop.f32.mrf.mxu0  ;;  %v763_v42 = vpop.f32.mrf.mxu1 }
 0x116   :  { %550 = vpow2.f32 %v347_v33  ;;  %v290_v43 = vrot.slane %v289_v36, 4 }
 0x117   :  { %552 = vpow2.f32 %v349_v34  ;;  %v287_v44 = vrot.slane %v286_v38, 1  ;;  %v315_v45 = vrot.slane %v314_v39, 1  ;;  %v318_v46 = vrot.slane %v317_v40, 4  ;;  %v765_v47 = vpop.f32.mrf.mxu0  ;;  %v767_v48 = vpop.f32.mrf.mxu1 }
 0x118   :  { %554 = vpow2.f32 %v363_v35  ;;  %v291_v49 = vmax.f32 %v289_v36, %v290_v43 }
 0x119   :  { %556 = vpow2.f32 %v365_v37  ;;  %v288_v50 = vmax.f32 %v286_v38, %v287_v44  ;;  %v316_v53 = vmax.f32 %v314_v39, %v315_v45  ;;  %v319_v54 = vmax.f32 %v317_v40, %v318_v46  ;;  %v769_v55 = vpop.f32.mrf.mxu0  ;;  %v771_v56 = vpop.f32.mrf.mxu1 }
 0x11a   :  { %v292_v59 = vrot.slane %v291_v49, 2 }
 0x11b   :  { %v333_v60 = vsub.f32 %v725_v61, %v288_v50  ;;  %v334_v63 = vsub.f32 %v733_v5, %v288_v50  ;;  %v341_v0 = vsub.f32 %v727_v62, %v316_v53  ;;  %v342_v3 = vsub.f32 %v735_v6, %v316_v53  ;;  %v777_v4 = vpop.f32.mrf.mxu0  ;;  %v779_v7 = vpop.f32.mrf.mxu1 }
 0x11c   :  { %v293_v8 = vmax.f32 %v291_v49, %v292_v59  ;;  %v320_v9 = vrot.slane %v319_v54, 2  ;;  %v296_v10 = vmax.f32 %v765_v47, %v777_v4  ;;  %v324_v13 = vmax.f32 %v767_v48, %v779_v7 }
 0x11d   :  { %v351_v14 = vmul.f32 1.442695, %v333_v60  ;;  %v353_v61 = vmul.f32 1.442695, %v334_v63  ;;  %v367_v15 = vmul.f32 1.442695, %v341_v0 }
 0x11e   :  { %v369_v5 = vmul.f32 1.442695, %v342_v3  ;;  %v294_v16 = vrot.slane %v293_v8, 1  ;;  %v321_v62 = vmax.f32 %v319_v54, %v320_v9  ;;  %v297_v19 = vrot.slane %v296_v10, 4 }
 0x11f   :  { %558 = vpow2.f32 %v351_v14  ;;  %v325_v6 = vrot.slane %v324_v13, 4 }
 0x120   :  { %560 = vpow2.f32 %v353_v61  ;;  %v295_v20 = vmax.f32 %v293_v8, %v294_v16  ;;  %v322_v21 = vrot.slane %v321_v62, 1  ;;  %v298_v22 = vmax.f32 %v296_v10, %v297_v19 }
 0x121   :  { %562 = vpow2.f32 %v367_v15  ;;  %v326_v25 = vmax.f32 %v324_v13, %v325_v6 }
 0x122   :  { %564 = vpow2.f32 %v369_v5  ;;  %v335_v26 = vsub.f32 %v745_v17, %v295_v20  ;;  %v336_v27 = vsub.f32 %v753_v31, %v295_v20  ;;  %v323_v28 = vmax.f32 %v321_v62, %v322_v21 }
 0x123   :  { %v787_v29 = vpop.eup %550  ;;  %v299_v30 = vrot.slane %v298_v22, 2  ;;  %v327_v33 = vrot.slane %v326_v25, 2 }
 0x124   :  { %v789_v34 = vpop.eup %552  ;;  %v355_v35 = vmul.f32 1.442695, %v335_v26  ;;  %v357_v36 = vmul.f32 1.442695, %v336_v27  ;;  %v343_v37 = vsub.f32 %v747_v18, %v323_v28  ;;  %v344_v17 = vsub.f32 %v755_v32, %v323_v28 }
 0x125   :  { %v792_v38 = vpop.eup %554  ;;  %v379_v39 = vadd.f32 %v789_v34, %v787_v29  ;;  %v300_v40 = vmax.f32 %v298_v22, %v299_v30  ;;  %v328_v44 = vmax.f32 %v326_v25, %v327_v33 }
 0x126   :  { %v797_v31 = vpop.eup %556  ;;  %566 = vpow2.f32 %v355_v35  ;;  %v371_v43 = vmul.f32 1.442695, %v343_v37  ;;  %v373_v18 = vmul.f32 1.442695, %v344_v17 }
 0x127   :  { %v380_v45 = vrot.slane %v379_v39, 4  ;;  %v407_v46 = vadd.f32 %v797_v31, %v792_v38  ;;  %568 = vpow2.f32 %v357_v36  ;;  %v301_v49 = vrot.slane %v300_v40, 1 }
 0x128   :  { %570 = vpow2.f32 %v371_v43  ;;  %v329_v50 = vrot.slane %v328_v44, 1 }
 0x129   :  { %v381_v53 = vadd.f32 %v380_v45, %v379_v39  ;;  %v408_v54 = vrot.slane %v407_v46, 4  ;;  %572 = vpow2.f32 %v373_v18  ;;  %v302_v59 = vmax.f32 %v300_v40, %v301_v49  ;;  %v832_v49 = vld [vmem:[%s900_s2] ss:$0 sm:$0xff]  ;;  %s671_s2 = smov [#allocation7]  }
 0x12a   :  { %v330_v32 = vmax.f32 %v328_v44, %v329_v50  ;;  %s496_s26 = sshll.u32 %s671_s2, 4  ;;  %s497_s26 = int_to_ptr.vmem [resolvable:$true] %s496_s26 }
 0x12b   :  { %v382_v60 = vrot.slane %v381_v53, 2  ;;  %v409_v63 = vadd.f32 %v408_v54, %v407_v46  ;;  %v337_v3 = vsub.f32 %v765_v47, %v302_v59  ;;  %v338_v8 = vsub.f32 %v777_v4, %v302_v59  ;;  %s638_s27 = scalar_lea.vmem %s497_s26, 2048  ;;  %p643_p11 = scmp.lt.s32.totalorder %s497_s26, %s497_s26 }
 0x12c   :  { %v801_v0 = vpop.eup %558  ;;  %v345_v9 = vsub.f32 %v767_v48, %v330_v32  ;;  %v346_v61 = vsub.f32 %v779_v7, %v330_v32  ;;  %p639_p10 = scmp.ne.s32.totalorder %s497_s26, %s638_s27  ;;  %p644_p12 = scmp.lt.s32.totalorder %s638_s27, %s638_s27 }
 0x12d   :  { %v806_v10 = vpop.eup %560  ;;  %v383_v13 = vadd.f32 %v382_v60, %v381_v53  ;;  %v410_v14 = vrot.slane %v409_v63, 2  ;;  %v359_v16 = vmul.f32 1.442695, %v337_v3  ;;  %v361_v62 = vmul.f32 1.442695, %v338_v8 }
 0x12e   :  { %v809_v15 = vpop.eup %562  ;;  %v386_v5 = vadd.f32 %v806_v10, %v801_v0  ;;  %v375_v4 = vmul.f32 1.442695, %v345_v9  ;;  %v377_v7 = vmul.f32 1.442695, %v346_v61  ;;  %v259_v3 = vadd.f32 %v832_v49, %v717_v51  ;;  %p645_p13 = por %p644_p12, %p643_p11 }
 0x12f   :  { %v813_v19 = vpop.eup %564  ;;  %v411_v47 = vadd.f32 %v410_v14, %v409_v63  ;;  %v384_v6 = vrot.slane %v383_v13, 1  ;;  %574 = vpow2.f32 %v359_v16  ;;  %v260_v8 = vadd.f32 %v832_v49, %v721_v57 }
 0x130   :  { %v387_v20 = vrot.slane %v386_v5, 4  ;;  %v414_v48 = vadd.f32 %v813_v19, %v809_v15  ;;  %576 = vpow2.f32 %v361_v62  ;;  %v267_v14 = vadd.f32 %v832_v49, %v719_v52  ;;  %p646_p0 = pnand %p645_p13, %p639_p10 }
 0x131   :  { %v385_v21 = vadd.f32 %v384_v6, %v383_v13  ;;  %v412_v22 = vrot.slane %v411_v47, 1  ;;  %578 = vpow2.f32 %v375_v4  ;;  %v268_v61 = vadd.f32 %v832_v49, %v723_v58 }
 0x132   :  { %v388_v25 = vadd.f32 %v387_v20, %v386_v5  ;;  %v415_v26 = vrot.slane %v414_v48, 4  ;;  %v443_v62 = vmul.f32 %v787_v29, %v259_v3  ;;  %v444_v51 = vmul.f32 %v789_v34, %v260_v8 }
 0x133   :  { %v817_v27 = vpop.eup %566  ;;  %580 = vrcp.f32 %v385_v21  ;;  %v413_v28 = vadd.f32 %v412_v22, %v411_v47  ;;  %v451_v4 = vmul.f32 %v792_v38, %v267_v14  ;;  %v452_v52 = vmul.f32 %v797_v31, %v268_v61 }
 0x134   :  { %v819_v30 = vpop.eup %568  ;;  %v389_v33 = vrot.slane %v388_v25, 2  ;;  %v416_v35 = vadd.f32 %v415_v26, %v414_v48  ;;  %582 = vpow2.f32 %v377_v7 }
 0x135   :  { %v821_v36 = vpop.eup %570  ;;  %584 = vrcp.f32 %v413_v28  ;;  %v393_v37 = vadd.f32 %v819_v30, %v817_v27 }
 0x136   :  { %v390_v39 = vadd.f32 %v389_v33, %v388_v25  ;;  %v417_v17 = vrot.slane %v416_v35, 2  ;;  %v825_v40 = vpop.eup %572 }
 0x137   :  { %v394_v43 = vrot.slane %v393_v37, 4  ;;  %v421_v46 = vadd.f32 %v825_v40, %v821_v36 }
 0x138   :  { %v418_v44 = vadd.f32 %v417_v17, %v416_v35  ;;  %v391_v45 = vrot.slane %v390_v39, 1 }
 0x139   :  { %v395_v18 = vadd.f32 %v394_v43, %v393_v37  ;;  %v422_v54 = vrot.slane %v421_v46, 4  ;;  %v261_v37 = vadd.f32 %v832_v49, %v729_v1  ;;  %v269_v43 = vadd.f32 %v832_v49, %v731_v2 }
 0x13a   :  { %v392_v50 = vadd.f32 %v391_v45, %v390_v39  ;;  %v419_v53 = vrot.slane %v418_v44, 1  ;;  %v262_v39 = vadd.f32 %v832_v49, %v741_v11 }
 0x13b   :  { %v396_v59 = vrot.slane %v395_v18, 2  ;;  %v423_v60 = vadd.f32 %v422_v54, %v421_v46  ;;  %v445_v45 = vmul.f32 %v801_v0, %v261_v37  ;;  %v453_v1 = vmul.f32 %v809_v15, %v269_v43 }
 0x13c   :  { %586 = vrcp.f32 %v392_v50  ;;  %v420_v32 = vadd.f32 %v419_v53, %v418_v44  ;;  %v834_v63 = vpop.eup %574  ;;  %v446_v46 = vmul.f32 %v806_v10, %v262_v39 }
 0x13d   :  { %v397_v9 = vadd.f32 %v396_v59, %v395_v18  ;;  %v840_v13 = vpop.eup %576  ;;  %v424_v5 = vrot.slane %v423_v60, 2  ;;  %v270_v18 = vadd.f32 %v832_v49, %v743_v12  ;;  %v263_v12 = vadd.f32 %v832_v49, %v749_v23 }
 0x13e   :  { %588 = vrcp.f32 %v420_v32  ;;  %v846_v16 = vpop.eup %578  ;;  %v400_v57 = vadd.f32 %v840_v13, %v834_v63 }
 0x13f   :  { %v398_v47 = vrot.slane %v397_v9, 1  ;;  %v425_v20 = vadd.f32 %v424_v5, %v423_v60  ;;  %v454_v32 = vmul.f32 %v813_v19, %v270_v18  ;;  %v447_v19 = vmul.f32 %v817_v27, %v263_v12 }
 0x140   :  { %v581_v6 = vpop.eup %580  ;;  %v401_v7 = vrot.slane %v400_v57, 4  ;;  %v271_v5 = vadd.f32 %v832_v49, %v751_v24  ;;  %v265_v24 = vadd.f32 %v832_v49, %v769_v55 }
 0x141   :  { %v854_v48 = vpop.eup %582  ;;  %v459_v58 = vmul.f32 %v581_v6, %v443_v62  ;;  %v460_v21 = vmul.f32 %v581_v6, %v444_v51  ;;  %v399_v22 = vadd.f32 %v398_v47, %v397_v9  ;;  %v426_v29 = vrot.slane %v425_v20, 1 }
 0x142   :  { %v585_v25 = vpop.eup %584  ;;  %v428_v34 = vadd.f32 %v854_v48, %v846_v16  ;;  %v402_v38 = vadd.f32 %v401_v7, %v400_v57  ;;  %v264_v9 = vadd.f32 %v832_v49, %v761_v41  ;;  %v272_v62 = vadd.f32 %v832_v49, %v763_v42 }
 0x143   :  { %475 = vst [vmem:[#allocation7] sm:$0xff] %v459_v58  ;;  %476 = vst [vmem:[#allocation7 + $0x8] sm:$0xff] %v460_v21  ;;  %v467_v26 = vmul.f32 %v585_v25, %v451_v4  ;;  %v468_v28 = vmul.f32 %v585_v25, %v452_v52  ;;  %590 = vrcp.f32 %v399_v22  ;;  %v427_v33 = vadd.f32 %v426_v29, %v425_v20  ;;  %v249_v4 = vpop.f32.mrf.mxu1 }
 0x144   :  { %v429_v31 = vrot.slane %v428_v34, 4  ;;  %v403_v35 = vrot.slane %v402_v38, 2  ;;  %v448_v14 = vmul.f32 %v819_v30, %v264_v9  ;;  %v455_v41 = vmul.f32 %v821_v36, %v271_v5  ;;  %v201_v30 = vpop.f32.mrf.mxu0 }
 0x145   :  { %483 = vst [vmem:[#allocation7 + $0x40] sm:$0xff] %v467_v26  ;;  %484 = vst [vmem:[#allocation7 + $0x48] sm:$0xff] %v468_v28  ;;  %592 = vrcp.f32 %v427_v33  ;;  %v456_v47 = vmul.f32 %v825_v40, %v272_v62  ;;  %v266_v42 = vadd.f32 %v832_v49, %v201_v30  ;;  %v449_v52 = vmul.f32 %v834_v63, %v265_v24 }
 0x146   :  { %v430_v17 = vadd.f32 %v429_v31, %v428_v34  ;;  %v404_v44 = vadd.f32 %v403_v35, %v402_v38  ;;  %v273_v40 = vadd.f32 %v832_v49, %v771_v56  ;;  %v274_v58 = vadd.f32 %v832_v49, %v249_v4 }
 0x147   :  { %v450_v36 = vmul.f32 %v840_v13, %v266_v42 }
 0x148   :  { %v431_v50 = vrot.slane %v430_v17, 2  ;;  %v405_v54 = vrot.slane %v404_v44, 1  ;;  %v457_v7 = vmul.f32 %v846_v16, %v273_v40  ;;  %v458_v55 = vmul.f32 %v854_v48, %v274_v58 }
 0x149   :  { %v587_v53 = vpop.eup %586 }
 0x14a   :  { %v461_v59 = vmul.f32 %v587_v53, %v445_v45  ;;  %v462_v11 = vmul.f32 %v587_v53, %v446_v46  ;;  %v432_v60 = vadd.f32 %v431_v50, %v430_v17  ;;  %v406_v2 = vadd.f32 %v405_v54, %v404_v44 }
 0x14b   :  { %v589_v3 = vpop.eup %588 }
 0x14c   :  { %477 = vst [vmem:[#allocation7 + $0x10] sm:$0xff] %v461_v59  ;;  %478 = vst [vmem:[#allocation7 + $0x18] sm:$0xff] %v462_v11  ;;  %v469_v0 = vmul.f32 %v589_v3, %v453_v1  ;;  %v470_v8 = vmul.f32 %v589_v3, %v454_v32  ;;  %v433_v10 = vrot.slane %v432_v60, 1  ;;  %594 = vrcp.f32 %v406_v2 }
 0x14e   :  { %485 = vst [vmem:[#allocation7 + $0x50] sm:$0xff] %v469_v0  ;;  %486 = vst [vmem:[#allocation7 + $0x58] sm:$0xff] %v470_v8  ;;  %v434_v15 = vadd.f32 %v433_v10, %v432_v60 }
 0x150   :  { %v591_v61 = vpop.eup %590  ;;  %596 = vrcp.f32 %v434_v15 }
 0x151   :  { %v463_v23 = vmul.f32 %v591_v61, %v447_v19  ;;  %v464_v51 = vmul.f32 %v591_v61, %v448_v14 }
 0x152   :  { %v593_v57 = vpop.eup %592 }
 0x153   :  { %479 = vst [vmem:[#allocation7 + $0x20] sm:$0xff] %v463_v23  ;;  %480 = vst [vmem:[#allocation7 + $0x28] sm:$0xff] %v464_v51  ;;  %v471_v27 = vmul.f32 %v593_v57, %v455_v41  ;;  %v472_v6 = vmul.f32 %v593_v57, %v456_v47 }
 0x155   :  { %487 = vst [vmem:[#allocation7 + $0x60] sm:$0xff] %v471_v27  ;;  %488 = vst [vmem:[#allocation7 + $0x68] sm:$0xff] %v472_v6 }
 0x159   :  { %v595_v20 = vpop.eup %594 }
 0x15a   :  { %v465_v21 = vmul.f32 %v595_v20, %v449_v52  ;;  %v466_v22 = vmul.f32 %v595_v20, %v450_v36 }
 0x15c   :  { %481 = vst [vmem:[#allocation7 + $0x30] sm:$0xff] %v465_v21  ;;  %482 = vst [vmem:[#allocation7 + $0x38] sm:$0xff] %v466_v22 }
 0x15d   :  { %v597_v25 = vpop.eup %596 }
 0x15e   :  { %v473_v63 = vmul.f32 %v597_v25, %v457_v7  ;;  %v474_v29 = vmul.f32 %v597_v25, %v458_v55 }
 0x160   :  { %489 = vst [vmem:[#allocation7 + $0x70] sm:$0xff] %v473_v63  ;;  %490 = vst [vmem:[#allocation7 + $0x78] sm:$0xff] %v474_v29 }
 0x161   :  { %649 = shalt.err (!%p646_p0)
}
 0x162   :  { %502 = dma.vmem_to_hbm [thread:$0]  %s497_s26, 2048, %s901_s3, [#allocation4], %s665_s15, %s665_s15, %s666_s16  }
 0x163   :  { %662 = dma.done.wait [#allocation4], 2048  }
 0x164   :  { %663 = vsyncadd [#allocation4], 4294965248 }
 0x165   :  { %506 = vsyncpa [#allocation3], 1 }
 0x166   :  { %507 = vsyncpa [#allocation6], 1 }
 0x167   :  { %508 = vsyncpa [#allocation4], 1 }

</bundles_post_ra>
